<compile_context>
chip_gen: v7x
topology: tpu7x:2x2x1
jax: 0.10.0
libtpu: 0.0.40
codegen_flags: <defaults>
</compile_context>

<pallas_src>
import functools

import jax
import jax.numpy as jnp
from jax.experimental import pallas as pl
from jax.experimental.pallas import tpu as pltpu

LANES = 128
SUBLANES = 8
DEFAULT_TILE_ROWS = 4096  # 2 MiB per f32 input block; 8 MiB total double-buffered


def _accuracy_kernel(p_ref, t_ref, cnt_ref, acc_ref, *, tile_rows, n_rows, n_blocks):
    """Per-tile: count positions where (preds >= 0) == (targets > 0.5)."""
    i = pl.program_id(0)

    # sigmoid is monotone with sigmoid(0) == 0.5, so sigmoid(p) >= 0.5  <=>  p >= 0.
    # Native-dtype compares: 0 and 0.5 are exact in f32/bf16/f16; ints promote cleanly.
    pred_pos = p_ref[...] >= 0
    targ_pos = t_ref[...] > 0.5
    match = pred_pos == targ_pos

    # Mask rows past the true end of the array (ragged last block reads padding/garbage).
    if n_blocks * tile_rows != n_rows:  # static check, resolved at trace time
        row = i * tile_rows + jax.lax.broadcasted_iota(
            jnp.int32, (tile_rows, LANES), 0
        )
        match = jnp.logical_and(match, row < n_rows)

    m32 = match.astype(jnp.int32)

    if n_blocks == 1:
        # Single tile: reduce directly to the scalar output (one XLU reduce total).
        cnt_ref[0, 0] = jnp.sum(m32)
    else:
        @pl.when(i == 0)
        def _init():
            acc_ref[...] = jnp.zeros_like(acc_ref)

        # Elementwise accumulate into a vreg-shaped (8,128) accumulator: pure VPU adds,
        # no per-step cross-lane XLU reduce and no per-step SMEM scalar RMW. The
        # (tile_rows//8, 8, 128) reshape matches the native (8,128) tiling -> free.
        acc_ref[...] += jnp.sum(
            m32.reshape(tile_rows // SUBLANES, SUBLANES, LANES), axis=0
        )

        @pl.when(i == n_blocks - 1)
        def _finalize():
            cnt_ref[0, 0] = jnp.sum(acc_ref[...])


@functools.partial(jax.jit, static_argnames=("tile_rows",))
def _accuracy_count(preds, targets, tile_rows=DEFAULT_TILE_ROWS):
    """Returns the int32 count of matching positions."""
    p = preds.reshape(-1)
    t = targets.reshape(-1)
    total = p.shape[0]

    # Only lane-pad when numel isn't a multiple of 128 (rare, small-shape fallback).
    # Zero padding is safe: 0 >= 0 is True while 0 > 0.5 is False -> mismatch -> +0.
    lane_pad = (-total) % LANES
    if lane_pad:
        p = jnp.pad(p, (0, lane_pad))
        t = jnp.pad(t, (0, lane_pad))
    n_rows = (total + lane_pad) // LANES

    p = p.reshape(n_rows, LANES)  # free reshape (no pad copy in the common case)
    t = t.reshape(n_rows, LANES)

    # Block rows: full extent for small inputs (single step), otherwise big tiles.
    if n_rows <= tile_rows:
        tr = n_rows
    else:
        # Multi-block path reshapes (tr, 128) -> (tr/8, 8, 128); keep tr a multiple of 8.
        tr = max(SUBLANES, tile_rows - (tile_rows % SUBLANES))
    n_blocks = (n_rows + tr - 1) // tr

    kernel = functools.partial(
        _accuracy_kernel, tile_rows=tr, n_rows=n_rows, n_blocks=n_blocks
    )

    count = pl.pallas_call(
        kernel,
        out_shape=jax.ShapeDtypeStruct((1, 1), jnp.int32),
        grid_spec=pltpu.PrefetchScalarGridSpec(
            num_scalar_prefetch=0,
            grid=(n_blocks,),
            in_specs=[
                pl.BlockSpec((tr, LANES), lambda i: (i, 0)),
                pl.BlockSpec((tr, LANES), lambda i: (i, 0)),
            ],
            out_specs=pl.BlockSpec((1, 1), lambda i: (0, 0), memory_space=pltpu.SMEM),
            scratch_shapes=[pltpu.VMEM((SUBLANES, LANES), jnp.int32)],
        ),
        compiler_params=pltpu.CompilerParams(
            dimension_semantics=("arbitrary",)  # sequential reduction axis
        ),
    )(p, t)
    return count[0, 0]


def accuracy_forward(preds, targets, tile_rows=DEFAULT_TILE_ROWS):
    """Returns (batch_accuracy, correct_i, total_i) matching the PyTorch module."""
    assert preds.shape == targets.shape
    total_i = preds.size
    correct_i = _accuracy_count(preds, targets, tile_rows=tile_rows)
    acc = correct_i.astype(jnp.float32) / jnp.float32(total_i)
    return acc, correct_i, jnp.int32(total_i)


class AccuracyState:
    """Mirrors the stateful PyTorch module (correct/total counters)."""

    def __init__(self):
        self.correct = jnp.int32(0)
        self.total = jnp.int32(0)

    def forward(self, preds, targets):
        acc, correct_i, total_i = accuracy_forward(preds, targets)
        self.correct = self.correct + correct_i
        self.total = self.total + total_i
        return acc

    def compute(self):
        return self.correct.astype(jnp.float32) / self.total.astype(jnp.float32)

    def reset(self):
        self.correct = jnp.int32(0)
        self.total = jnp.int32(0)


if __name__ == "__main__":
    key = jax.random.PRNGKey(0)
    metric = AccuracyState()

    # Case 1: NCHW logits (2048 elems = 16 rows) -> single-block fast path.
    k1, k2 = jax.random.split(key)
    shape = (2, 4, 16, 16)
    preds = jax.random.normal(k1, shape, dtype=jnp.float32)  # logits
    targets = (jax.random.uniform(k2, shape) > 0.5).astype(jnp.float32)

    acc = jax.block_until_ready(metric.forward(preds, targets))
    ref_c = jnp.sum((jax.nn.sigmoid(preds) >= 0.5) == (targets > 0.5))
    ref_acc = ref_c.astype(jnp.float32) / preds.size
    assert jnp.allclose(acc, ref_acc), (acc, ref_acc)
    assert int(metric.total) == preds.size

    # Case 2: multi-block grid with a ragged (masked) last tile.
    k3, k4 = jax.random.split(k1)
    shape2 = (2, 4, 16, 20)  # 2560 elems = 20 rows; tile_rows=8 -> blocks of 8, 8, 4
    preds2 = jax.random.normal(k3, shape2, dtype=jnp.float32)
    targets2 = (jax.random.uniform(k4, shape2) > 0.5).astype(jnp.float32)
    acc2, c2, t2 = accuracy_forward(preds2, targets2, tile_rows=8)
    acc2 = jax.block_until_ready(acc2)
    ref_c2 = jnp.sum((jax.nn.sigmoid(preds2) >= 0.5) == (targets2 > 0.5))
    assert int(c2) == int(ref_c2), (int(c2), int(ref_c2))
    assert jnp.allclose(acc2, ref_c2.astype(jnp.float32) / preds2.size)

    # Case 3: bf16 logits (native dtype kept) with numel % 128 != 0 (lane-pad fallback).
    k5, k6 = jax.random.split(k3)
    shape3 = (3, 5, 7)  # 105 elems
    preds3 = jax.random.normal(k5, shape3, dtype=jnp.bfloat16)
    targets3 = (jax.random.uniform(k6, shape3) > 0.5).astype(jnp.float32)
    acc3, c3, t3 = accuracy_forward(preds3, targets3)
    acc3 = jax.block_until_ready(acc3)
    ref_c3 = jnp.sum(
        (jax.nn.sigmoid(preds3.astype(jnp.float32)) >= 0.5) == (targets3 > 0.5)
    )
    assert int(c3) == int(ref_c3), (int(c3), int(ref_c3))

    print("KERNEL_OK")
</pallas_src>

<mosaic_0001>
module attributes {stable_mosaic.version = 11 : i64} {
  func.func @_accuracy_kernel(%arg0: i32, %arg1: memref<16x128xf32, #tpu.memory_space<vmem>>, %arg2: memref<16x128xf32, #tpu.memory_space<vmem>>, %arg3: memref<1x1xi32, #tpu.memory_space<smem>>, %arg4: memref<8x128xi32, #tpu.memory_space<vmem>>) attributes {dimension_semantics = [#tpu.dimension_semantics<arbitrary>], iteration_bounds = array<i64: 1>, scalar_prefetch = 0 : i64, scratch_operands = 1 : i64, tpu.core_type = #tpu.core_type<tc>, window_params = [{transform_indices = @transform_0, window_bounds = array<i64: 16, 128>}, {transform_indices = @transform_1, window_bounds = array<i64: 16, 128>}, {transform_indices = @transform_2, window_bounds = array<i64: 1, 1>}]} {
    %c0 = arith.constant 0 : index
    %c0_0 = arith.constant 0 : index
    %0 = vector.load %arg1[%c0, %c0_0] : memref<16x128xf32, #tpu.memory_space<vmem>>, vector<16x128xf32>
    %cst = arith.constant 0.000000e+00 : f32
    %1 = vector.broadcast %cst : f32 to vector<16x128xf32>
    %2 = arith.cmpf oge, %0, %1 : vector<16x128xf32>
    %c0_1 = arith.constant 0 : index
    %c0_2 = arith.constant 0 : index
    %3 = vector.load %arg2[%c0_1, %c0_2] : memref<16x128xf32, #tpu.memory_space<vmem>>, vector<16x128xf32>
    %cst_3 = arith.constant 5.000000e-01 : f32
    %4 = vector.broadcast %cst_3 : f32 to vector<16x128xf32>
    %5 = arith.cmpf ogt, %3, %4 : vector<16x128xf32>
    %6 = arith.xori %2, %5 : vector<16x128xi1>
    %cst_4 = arith.constant dense<true> : vector<16x128xi1>
    %7 = arith.xori %6, %cst_4 : vector<16x128xi1>
    %8 = arith.extui %7 : vector<16x128xi1> to vector<16x128xi32>
    %9 = vector.shape_cast %8 : vector<16x128xi32> to vector<1x16x128xi32>
    %cst_5 = arith.constant dense<0> : vector<1xi32>
    %10 = vector.multi_reduction <add>, %9, %cst_5 [1, 2] : vector<1x16x128xi32> to vector<1xi32>
    %11 = vector.shape_cast %10 : vector<1xi32> to vector<1x1x1xi32>
    %12 = vector.extract %11[0, 0, 0] : i32 from vector<1x1x1xi32>
    %c0_6 = arith.constant 0 : index
    %c0_7 = arith.constant 0 : index
    %13 = memref.load %arg3[%c0_6, %c0_7] : memref<1x1xi32, #tpu.memory_space<smem>>
    memref.store %12, %arg3[%c0_6, %c0_7] : memref<1x1xi32, #tpu.memory_space<smem>>
    return
  }
  func.func @transform_0(%arg0: i32) -> (i32, i32) {
    %c0_i32 = arith.constant 0 : i32
    %c0_i32_0 = arith.constant 0 : i32
    return %arg0, %c0_i32 : i32, i32
  }
  func.func @transform_1(%arg0: i32) -> (i32, i32) {
    %c0_i32 = arith.constant 0 : i32
    %c0_i32_0 = arith.constant 0 : i32
    return %arg0, %c0_i32 : i32, i32
  }
  func.func @transform_2(%arg0: i32) -> (i32, i32) {
    %c0_i32 = arith.constant 0 : i32
    %c0_i32_0 = arith.constant 0 : i32
    %c0_i32_1 = arith.constant 0 : i32
    return %c0_i32, %c0_i32_0 : i32, i32
  }
}

</mosaic_0001>

<bundles_post_ra>
// kernel: _accuracy_count.1
= control target key start
LH: loop header
LB: loop body
LE: loop exit
PB: predicated region body
PF: predicated region fallthrough
CT: control target
= control target key end

     0   :  { %s120_s0 = inlined_call_operand.vmem [shape: f32[16,128], index: 0, kind: input, shape index: {}]   ;;  %s121_s1 = inlined_call_operand.vmem [shape: f32[16,128], index: 1, kind: input, shape index: {}]   ;;  %s122_s2 = inlined_call_operand.hbm [shape: s32[1,1], index: 2, kind: output, shape index: {}]  }
   0x1   :  { %v12_v0 = vld [vmem:[%s120_s0] sm:$0xff]  ;;  %v13_v1 = vld [vmem:[%s120_s0 + $0x8] sm:$0xff] }
   0x2   :  { %v16_v2 = vld [vmem:[%s121_s1] sm:$0xff]  ;;  %vm14_vm0 = vcmp.ge.f32.partialorder %v12_v0, 0.0  ;;  %vm15_vm1 = vcmp.ge.f32.partialorder %v13_v1, 0.0  ;;  %v17_v3 = vld [vmem:[%s121_s1 + $0x8] sm:$0xff] }
   0x3   :  { %vm18_vm2 = vcmp.gt.f32.partialorder %v16_v2, 0.5 }
   0x4   :  { %7 = vsyncpa [#allocation4], 0  ;;  %vm19_vm3 = vcmp.gt.f32.partialorder %v17_v3, 0.5  ;;  %vm78_vm6 = vmmov 1   ;;  %v79_v4 = vmov 0   ;;  %s66_s18 = scalar_lea.hbm %s122_s2, 16 }
   0x5   :  { %vm20_vm4 = vmxor %vm14_vm0, %vm18_vm2  ;;  %p67_p0 = scmp.ne.s32.totalorder %s122_s2, %s66_s18  ;;  %p70_p1 = scmp.lt.u32.totalorder %s66_s18, %s122_s2 }
   0x6   :  { %vm21_vm5 = vmxor %vm15_vm1, %vm19_vm3 }
   0x7   :  { %vm22_vm7 = vmxor %vm20_vm4, %vm78_vm6  ;;  %p72_p2 = pnand %p70_p1, %p67_p0 }
   0x8   :  { %vm23_vm8 = vmxor %vm21_vm5, %vm78_vm6  ;;  %v24_v5 = vsel %vm22_vm7, 1, %v79_v4 }
   0x9   :  { %v25_v6 = vsel %vm23_vm8, 1, %v79_v4 }
   0xa   :  { %v26_v7 = vadd.s32 %v25_v6, %v24_v5 }
   0xc   :  { %v28_v8 = vshrl.u32 %v26_v7, 16  ;;  %v27_v9 = vand.u32 65535, %v26_v7 }
   0xe   :  { %v30_v10 = vcvt.s32.f32 %v28_v8  ;;  %v29_v11 = vcvt.s32.f32 %v27_v9 }
  0x10   :  { %33 = vadd.xlane.f32.xlu0 %v30_v10 }
  0x14   :  { %31 = vadd.xlane.f32.xlu0 %v29_v11 }
  0x9d   :  { %v34_v12 = vpop.xlane.xlu0 %33 }
  0x9e   :  { %v36_v13 = vcvt.f32.s32 %v34_v12 }
  0xa0   :  { %v37_v15 = vshll.u32 %v36_v13, 16 }
  0xa1   :  { %v32_v14 = vpop.xlane.xlu0 %31 }
  0xa2   :  { %v35_v16 = vcvt.f32.s32 %v32_v14 }
  0xa4   :  { %v38_v17 = vadd.s32 %v37_v15, %v35_v16 }
  0xa6   :  { %v39_v18 = vrot.slane %v38_v17, 4 }
  0xa8   :  { %v40_v19 = vadd.s32 %v39_v18, %v38_v17 }
  0xaa   :  { %v41_v20 = vrot.slane %v40_v19, 2 }
  0xac   :  { %v42_v21 = vadd.s32 %v41_v20, %v40_v19 }
  0xae   :  { %v43_v22 = vrot.slane %v42_v21, 1 }
  0xb0   :  { %v44_v23 = vadd.s32 %v43_v22, %v42_v21 }
  0xb2   :  { %61 = vpush %v44_v23 }
  0xe3   :  { %s62_s0 = spop %61 }
  0xe4   :  { %47 = sst [smem:[#allocation3]] %s62_s0 }
  0xe5   :  { %75 = shalt.err (!%p72_p2)
}
  0xe6   :  { %s80_s23 = smov [#allocation3]  }
  0xe7   :  { %55 = dma.smem_to_hbm %s80_s23, 16, %s122_s2, [#allocation4]  }
  0xe8   :  { %76 = dma.done.wait [#allocation4], 16  }
  0xe9   :  { %77 = vsyncadd [#allocation4], 4294967280 }
  0xea   :  { %59 = sfence }
  0xeb   :  { %60 = vsyncpa [#allocation4], 1 }

</bundles_post_ra>
